<compile_context>
chip_gen: v7x
topology: tpu7x:2x2x1
jax: 0.10.0
libtpu: 0.0.40
codegen_flags: <defaults>
</compile_context>

<pallas_src>
import functools
import math

import jax
import jax.numpy as jnp
from jax.experimental import pallas as pl
from jax.experimental.pallas import tpu as pltpu


def _cnn_clf_kernel(x_ref, w0_ref, w1_ref, bc_ref, wclf_ref, bclf_ref,
                    out_ref, *, L):
    # x_ref:  (TR, C)  f32 rows of the flattened (B*L, C) input
    # w0/w1:  (C, 2H)  bf16 conv taps k=0 / k=1 (start ++ end channels fused)
    # bc:     (1, 2H)  f32 conv bias
    # wclf:   (2, 2H)  f32 block-diagonal classifier (row 0 start, row 1 end)
    # bclf:   (2, 1)   f32 classifier bias
    # out:    (2, TR)  f32 logits, lane-dense (transposed) layout
    TR, C = x_ref.shape
    x0 = x_ref[...]                                         # single f32 load

    # Tap-1 operand: x1[i] = x0[i + 1] within the same batch element; the
    # last timestep of every element sees the F.pad zero column instead.
    # pltpu.roll matches jnp.roll semantics, so shift=TR-1 (== -1) pulls the
    # next row down via the XLU rotate slot with no materialized copy.  TR is
    # a multiple of L, so the wrapped-around final row is itself a batch-final
    # row and is zeroed by the mask regardless of what wrapped in.
    x1 = pltpu.roll(x0, shift=TR - 1, axis=0)
    row = jax.lax.broadcasted_iota(jnp.int32, (TR, 1), 0)   # row index in tile
    x1 = jnp.where(row % L == L - 1, 0.0, x1)

    # Conv1d(kernel_size=2): bf16 MXU operands, f32 accumulation.  (The roll
    # is done in f32 and each operand cast separately; rolling a packed bf16
    # tile along the sublane axis risks an unsupported/expensive relayout and
    # the extra f32->bf16 pack is cheap VPU filler at these widths.)
    conv = (
        jnp.dot(x0.astype(w0_ref.dtype), w0_ref[...],
                preferred_element_type=jnp.float32)
        + jnp.dot(x1.astype(w1_ref.dtype), w1_ref[...],
                  preferred_element_type=jnp.float32)
        + bc_ref[...]
    )                                                       # (TR, 2H) f32
    act = jnp.where(conv >= 0, conv, 0.01 * conv)           # LeakyReLU(0.01)

    # Block-diagonal classifier contracted against act's channel (lane) axis
    # so the result comes out (2, TR): lane-dense, unmasked writeback.
    # TODO(synk): if a bundle dump ever shows a full-tile vxpose of act here,
    # switch to act @ wclf^T into a (TR, 2) scratch and transpose that tiny
    # result instead.
    logits = jax.lax.dot_general(
        wclf_ref[...], act,
        dimension_numbers=(((1,), (1,)), ((), ())),
        preferred_element_type=jnp.float32) + bclf_ref[...]
    out_ref[...] = logits.astype(out_ref.dtype)


_TARGET_BLOCK_BYTES = 4 << 20        # ~4 MiB of f32 input rows per grid step


def _pick_row_tile(rows: int, L: int, C: int) -> int:
    """Rows per grid step.

    Constraints:
      * multiple of L, so the kernel-size-2 window never crosses a tile and
        the roll's wrap-around row is always a (masked) batch-final row;
      * when the grid has more than one step, also a multiple of 128, so the
        (TR, C) input block stays sublane-aligned and the lane-dense (2, TR)
        output block stays lane-aligned.
    Sized by bytes (not a flat row cap): ~4 MiB of f32 input per block
    amortizes the ~0.35us/step overhead at small C without blowing scoped
    VMEM at large C; when splitting is possible we force >= 2 grid steps so
    the "parallel" grid axis can shard rows across both v7x TensorCores.
    """
    step = (L * 128) // math.gcd(L, 128)          # lcm(L, 128)
    if rows % step != 0 or rows < 2 * step:
        # Cannot split while keeping aligned blocks: single grid step.
        # TODO(synk): very large B*L*C with B*L not a multiple of lcm(L,128)
        # would need a padded/ragged last block; not needed at these sizes.
        return rows
    want = max(step, (_TARGET_BLOCK_BYTES // (4 * C)) // step * step)
    want = min(want, max(step, ((rows // 2) // step) * step))   # >= 2 steps
    tile = want
    while tile > step and rows % tile:
        tile -= step
    return tile if rows % tile == 0 else rows


@jax.jit
def cnn_clf_forward(feat, w0, w1, bc, wclf2, bclf2):
    """feat: (B, L, C) float32 -> (B, L, 2) float32 (start, end logits)."""
    B, L, C = feat.shape
    H2 = w0.shape[1]                  # 2 * (feat_dim // 2)
    rows = B * L

    x2d = feat.reshape(rows, C)       # metadata-only reshape, no HBM copy
    w0b = w0.astype(jnp.bfloat16)     # bf16 MXU operands (f32 accumulation)
    w1b = w1.astype(jnp.bfloat16)
    # NOTE: if the upstream producer can emit feat directly in bf16, accept it
    # as-is (HBM-read-bound kernel) -- but do NOT add a wrapper-side cast.

    TR = _pick_row_tile(rows, L, C)
    grid = (rows // TR,)

    # VMEM budget: double-buffered input/output blocks + resident weights +
    # in-kernel f32/bf16 temporaries, with 2x headroom.  Never below the
    # 32 MiB default scoped limit (so small problems behave exactly like the
    # default) and capped at 64 MiB, matching v7x's per-TensorCore VMEM.
    vmem_est = (
        2 * TR * C * 4                # input blocks (double-buffered)
        + 2 * 2 * TR * 4              # (2, TR) output blocks
        + 2 * 2 * C * H2 * 2          # w0 + w1 bf16 (double-buffered)
        + 2 * (3 * H2 + 2) * 4        # bc, wclf2, bclf2
        + TR * C * (4 + 2 + 2)        # rolled x1 (f32) + two bf16 casts
        + 2 * TR * H2 * 4             # conv / act f32 temporaries
        + 2 * TR * 4                  # logits
    )
    vmem_limit = int(min(max(2 * vmem_est, 32 << 20), 64 << 20))

    kernel = functools.partial(_cnn_clf_kernel, L=L)
    out2 = pl.pallas_call(
        kernel,
        out_shape=jax.ShapeDtypeStruct((2, rows), jnp.float32),
        grid_spec=pltpu.PrefetchScalarGridSpec(
            num_scalar_prefetch=0,
            grid=grid,
            in_specs=[
                pl.BlockSpec((TR, C), lambda i: (i, 0)),
                # Weights/biases: constant index maps (DMA'd once, tiny).
                # pipeline_mode=pl.Buffered(1) would drop their second VMEM
                # buffer, but the headroom is negligible at these sizes.
                pl.BlockSpec((C, H2), lambda i: (0, 0)),
                pl.BlockSpec((C, H2), lambda i: (0, 0)),
                pl.BlockSpec((1, H2), lambda i: (0, 0)),
                pl.BlockSpec((2, H2), lambda i: (0, 0)),
                pl.BlockSpec((2, 1), lambda i: (0, 0)),
            ],
            out_specs=pl.BlockSpec((2, TR), lambda i: (0, i)),
        ),
        compiler_params=pltpu.CompilerParams(
            dimension_semantics=("parallel",),
            vmem_limit_bytes=vmem_limit),
    )(x2d, w0b, w1b, bc, wclf2, bclf2)

    # (2, B*L) lane-dense kernel output -> (B, L, 2) to match torch.cat(dim=2).
    return out2.T.reshape(B, L, 2)


def make_params(key, feat_dim):
    """Deterministic synthetic parameters matching CNN_clf.__init__ shapes."""
    H = feat_dim // 2
    keys = jax.random.split(key, 8)
    # Conv1d weights: torch shape (H, feat_dim, 2) per branch.
    conv_s = jax.random.normal(keys[0], (H, feat_dim, 2), jnp.float32) * 0.05
    conv_e = jax.random.normal(keys[1], (H, feat_dim, 2), jnp.float32) * 0.05
    bconv_s = jax.random.normal(keys[2], (H,), jnp.float32) * 0.05
    bconv_e = jax.random.normal(keys[3], (H,), jnp.float32) * 0.05
    # Linear(H, 1) classifiers, torch init: normal std=0.02 weights.
    wclf_s = jax.random.normal(keys[4], (H,), jnp.float32) * 0.02
    wclf_e = jax.random.normal(keys[5], (H,), jnp.float32) * 0.02
    bclf_s = jax.random.normal(keys[6], (), jnp.float32) * 0.05
    bclf_e = jax.random.normal(keys[7], (), jnp.float32) * 0.05

    # Fuse start/end branches along the conv-output-channel axis, tap-major.
    w0 = jnp.concatenate([conv_s[:, :, 0].T, conv_e[:, :, 0].T], axis=1)  # (C, 2H)
    w1 = jnp.concatenate([conv_s[:, :, 1].T, conv_e[:, :, 1].T], axis=1)  # (C, 2H)
    bc = jnp.concatenate([bconv_s, bconv_e]).reshape(1, 2 * H)            # (1, 2H)

    # Transposed block-diagonal classifier: row 0 = start head, row 1 = end.
    wclf2 = jnp.zeros((2, 2 * H), jnp.float32)
    wclf2 = wclf2.at[0, :H].set(wclf_s)
    wclf2 = wclf2.at[1, H:].set(wclf_e)
    bclf2 = jnp.stack([bclf_s, bclf_e]).reshape(2, 1)                     # (2, 1)
    return w0, w1, bc, wclf2, bclf2


def reference_forward(feat, w0, w1, bc, wclf2, bclf2):
    """Pure-JAX f32 reference mirroring the PyTorch forward."""
    B, L, C = feat.shape
    xp = jnp.pad(feat, ((0, 0), (0, 1), (0, 0)))
    x0, x1 = xp[:, :L, :], xp[:, 1:, :]
    conv = (jnp.einsum("blc,ch->blh", x0, w0)
            + jnp.einsum("blc,ch->blh", x1, w1) + bc[0])
    act = jnp.where(conv >= 0, conv, 0.01 * conv)
    return jnp.einsum("blh,oh->blo", act, wclf2) + bclf2[:, 0]


if __name__ == "__main__":
    feat_dim = 32   # C
    batch = 2       # B
    seq_len = 8     # L

    key = jax.random.PRNGKey(0)
    k_feat, k_params = jax.random.split(key)
    feat = jax.random.normal(k_feat, (batch, seq_len, feat_dim), jnp.float32)
    params = make_params(k_params, feat_dim)

    out = jax.block_until_ready(cnn_clf_forward(feat, *params))
    ref = reference_forward(feat, *params)

    assert out.shape == (batch, seq_len, 2)
    # Tolerance covers the bf16 rounding of the conv matmul inputs
    # (accumulation and all elementwise math stay in f32).
    assert jnp.allclose(out, ref, atol=1e-2, rtol=1e-2), "mismatch vs reference"

    print("KERNEL_OK")
</pallas_src>

<mosaic_0001>
module attributes {stable_mosaic.version = 11 : i64} {
  func.func @_cnn_clf_kernel(%arg0: i32, %arg1: memref<16x32xf32, #tpu.memory_space<vmem>>, %arg2: memref<32x32xbf16, #tpu.memory_space<vmem>>, %arg3: memref<32x32xbf16, #tpu.memory_space<vmem>>, %arg4: memref<1x32xf32, #tpu.memory_space<vmem>>, %arg5: memref<2x32xf32, #tpu.memory_space<vmem>>, %arg6: memref<2x1xf32, #tpu.memory_space<vmem>>, %arg7: memref<2x16xf32, #tpu.memory_space<vmem>>) attributes {dimension_semantics = [#tpu.dimension_semantics<parallel>], iteration_bounds = array<i64: 1>, scalar_prefetch = 0 : i64, scratch_operands = 0 : i64, tpu.core_type = #tpu.core_type<tc>, window_params = [{transform_indices = @transform_0, window_bounds = array<i64: 16, 32>}, {pipeline_mode = #tpu.pipeline_mode<synchronous>, transform_indices = @transform_1, window_bounds = array<i64: 32, 32>}, {pipeline_mode = #tpu.pipeline_mode<synchronous>, transform_indices = @transform_2, window_bounds = array<i64: 32, 32>}, {pipeline_mode = #tpu.pipeline_mode<synchronous>, transform_indices = @transform_3, window_bounds = array<i64: 1, 32>}, {pipeline_mode = #tpu.pipeline_mode<synchronous>, transform_indices = @transform_4, window_bounds = array<i64: 2, 32>}, {pipeline_mode = #tpu.pipeline_mode<synchronous>, transform_indices = @transform_5, window_bounds = array<i64: 2, 1>}, {transform_indices = @transform_6, window_bounds = array<i64: 2, 16>}]} {
    %c0 = arith.constant 0 : index
    %c0_0 = arith.constant 0 : index
    %0 = vector.load %arg1[%c0, %c0_0] : memref<16x32xf32, #tpu.memory_space<vmem>>, vector<16x32xf32>
    %c15_i32 = arith.constant 15 : i32
    %1 = tpu.dynamic_rotate %0 by %c15_i32 dim 0 : vector<16x32xf32>, i32 -> vector<16x32xf32>
    %2 = tpu.iota {dimensions = array<i32: 0>} : vector<16x1xi32>
    %c8_i32 = arith.constant 8 : i32
    %c0_i32 = arith.constant 0 : i32
    %3 = arith.cmpi eq, %c8_i32, %c0_i32 : i32
    %c1_i32 = arith.constant 1 : i32
    %4 = arith.select %3, %c1_i32, %c8_i32 : i32
    %5 = vector.broadcast %4 : i32 to vector<16x1xi32>
    %6 = arith.remsi %2, %5 : vector<16x1xi32>
    %c0_i32_1 = arith.constant 0 : i32
    %7 = vector.broadcast %c0_i32_1 : i32 to vector<16x1xi32>
    %8 = arith.cmpi ne, %6, %7 : vector<16x1xi32>
    %c0_i32_2 = arith.constant 0 : i32
    %9 = vector.broadcast %c0_i32_2 : i32 to vector<16x1xi32>
    %10 = arith.cmpi slt, %6, %9 : vector<16x1xi32>
    %c0_i32_3 = arith.constant 0 : i32
    %11 = arith.cmpi slt, %4, %c0_i32_3 : i32
    %12 = vector.broadcast %11 : i1 to vector<16x1xi1>
    %13 = vector.broadcast %12 : vector<16x1xi1> to vector<16x1xi1>
    %14 = arith.xori %10, %13 : vector<16x1xi1>
    %15 = arith.andi %14, %8 : vector<16x1xi1>
    %16 = vector.broadcast %4 : i32 to vector<16x1xi32>
    %17 = arith.addi %6, %16 : vector<16x1xi32>
    %18 = arith.select %15, %17, %6 : vector<16x1xi1>, vector<16x1xi32>
    %c7_i32 = arith.constant 7 : i32
    %19 = vector.broadcast %c7_i32 : i32 to vector<16x1xi32>
    %20 = arith.cmpi eq, %18, %19 : vector<16x1xi32>
    %cst = arith.constant 0.000000e+00 : f32
    %21 = vector.shape_cast %20 : vector<16x1xi1> to vector<16x1xi1>
    %22 = vector.broadcast %21 : vector<16x1xi1> to vector<16x32xi1>
    %23 = vector.broadcast %cst : f32 to vector<16x32xf32>
    %24 = arith.select %22, %23, %1 : vector<16x32xi1>, vector<16x32xf32>
    %25 = arith.truncf %0 : vector<16x32xf32> to vector<16x32xbf16>
    %c0_4 = arith.constant 0 : index
    %c0_5 = arith.constant 0 : index
    %26 = vector.load %arg2[%c0_4, %c0_5] : memref<32x32xbf16, #tpu.memory_space<vmem>>, vector<32x32xbf16>
    %cst_6 = arith.constant dense<0.000000e+00> : vector<16x32xf32>
    %27 = tpu.matmul %25, %26, %cst_6 {dimension_numbers = #tpu.dot_dimension_numbers<[1], [0], [0], [1], [0, 0, 1, 1], [], []>} : vector<16x32xbf16>, vector<32x32xbf16>, vector<16x32xf32> -> vector<16x32xf32>
    %28 = arith.truncf %24 : vector<16x32xf32> to vector<16x32xbf16>
    %c0_7 = arith.constant 0 : index
    %c0_8 = arith.constant 0 : index
    %29 = vector.load %arg3[%c0_7, %c0_8] : memref<32x32xbf16, #tpu.memory_space<vmem>>, vector<32x32xbf16>
    %cst_9 = arith.constant dense<0.000000e+00> : vector<16x32xf32>
    %30 = tpu.matmul %28, %29, %cst_9 {dimension_numbers = #tpu.dot_dimension_numbers<[1], [0], [0], [1], [0, 0, 1, 1], [], []>} : vector<16x32xbf16>, vector<32x32xbf16>, vector<16x32xf32> -> vector<16x32xf32>
    %31 = arith.addf %27, %30 : vector<16x32xf32>
    %c0_10 = arith.constant 0 : index
    %c0_11 = arith.constant 0 : index
    %32 = vector.load %arg4[%c0_10, %c0_11] : memref<1x32xf32, #tpu.memory_space<vmem>>, vector<1x32xf32>
    %33 = vector.broadcast %32 : vector<1x32xf32> to vector<16x32xf32>
    %34 = arith.addf %31, %33 : vector<16x32xf32>
    %cst_12 = arith.constant 0.000000e+00 : f32
    %35 = vector.broadcast %cst_12 : f32 to vector<16x32xf32>
    %36 = arith.cmpf oge, %34, %35 : vector<16x32xf32>
    %cst_13 = arith.constant 0.00999999977 : f32
    %37 = vector.broadcast %cst_13 : f32 to vector<16x32xf32>
    %38 = arith.mulf %37, %34 : vector<16x32xf32>
    %39 = arith.select %36, %34, %38 : vector<16x32xi1>, vector<16x32xf32>
    %c0_14 = arith.constant 0 : index
    %c0_15 = arith.constant 0 : index
    %40 = vector.load %arg5[%c0_14, %c0_15] : memref<2x32xf32, #tpu.memory_space<vmem>>, vector<2x32xf32>
    %cst_16 = arith.constant dense<0.000000e+00> : vector<2x16xf32>
    %41 = tpu.matmul %40, %39, %cst_16 {dimension_numbers = #tpu.dot_dimension_numbers<[1], [1], [0], [0], [0, 0, 1, 0], [], []>} : vector<2x32xf32>, vector<16x32xf32>, vector<2x16xf32> -> vector<2x16xf32>
    %c0_17 = arith.constant 0 : index
    %c0_18 = arith.constant 0 : index
    %42 = vector.load %arg6[%c0_17, %c0_18] : memref<2x1xf32, #tpu.memory_space<vmem>>, vector<2x1xf32>
    %43 = vector.broadcast %42 : vector<2x1xf32> to vector<2x16xf32>
    %44 = arith.addf %41, %43 : vector<2x16xf32>
    %c0_19 = arith.constant 0 : index
    %c0_20 = arith.constant 0 : index
    %45 = vector.load %arg7[%c0_19, %c0_20] : memref<2x16xf32, #tpu.memory_space<vmem>>, vector<2x16xf32>
    tpu.vector_store %arg7[%c0_19, %c0_20], %44 {strides = array<i32>} : memref<2x16xf32, #tpu.memory_space<vmem>>, vector<2x16xf32>,
    return
  }
  func.func @transform_0(%arg0: i32) -> (i32, i32) {
    %c0_i32 = arith.constant 0 : i32
    %c0_i32_0 = arith.constant 0 : i32
    return %arg0, %c0_i32 : i32, i32
  }
  func.func @transform_1(%arg0: i32) -> (i32, i32) {
    %c0_i32 = arith.constant 0 : i32
    %c0_i32_0 = arith.constant 0 : i32
    %c0_i32_1 = arith.constant 0 : i32
    return %c0_i32, %c0_i32_0 : i32, i32
  }
  func.func @transform_2(%arg0: i32) -> (i32, i32) {
    %c0_i32 = arith.constant 0 : i32
    %c0_i32_0 = arith.constant 0 : i32
    %c0_i32_1 = arith.constant 0 : i32
    return %c0_i32, %c0_i32_0 : i32, i32
  }
  func.func @transform_3(%arg0: i32) -> (i32, i32) {
    %c0_i32 = arith.constant 0 : i32
    %c0_i32_0 = arith.constant 0 : i32
    %c0_i32_1 = arith.constant 0 : i32
    return %c0_i32, %c0_i32_0 : i32, i32
  }
  func.func @transform_4(%arg0: i32) -> (i32, i32) {
    %c0_i32 = arith.constant 0 : i32
    %c0_i32_0 = arith.constant 0 : i32
    %c0_i32_1 = arith.constant 0 : i32
    return %c0_i32, %c0_i32_0 : i32, i32
  }
  func.func @transform_5(%arg0: i32) -> (i32, i32) {
    %c0_i32 = arith.constant 0 : i32
    %c0_i32_0 = arith.constant 0 : i32
    %c0_i32_1 = arith.constant 0 : i32
    return %c0_i32, %c0_i32_0 : i32, i32
  }
  func.func @transform_6(%arg0: i32) -> (i32, i32) {
    %c0_i32 = arith.constant 0 : i32
    %c0_i32_0 = arith.constant 0 : i32
    return %c0_i32, %arg0 : i32, i32
  }
}

</mosaic_0001>

<bundles_post_ra>
// kernel: cnn_clf_forward.1
= control target key start
LH: loop header
LB: loop body
LE: loop exit
PB: predicated region body
PF: predicated region fallthrough
CT: control target
= control target key end

     0   :  { %v28_v0 = vlaneseq  ;;  %v351_v1 = vmov 0.0   ;;  %vm352_vm0 = vmmov 0   ;;  %vm88_vm2 = vcmask 261120   ;;  %s428_s1 = inlined_call_operand.vmem [shape: bf16[32,32], index: 1, kind: input, shape index: {}]   ;;  %s429_s2 = inlined_call_operand.vmem [shape: bf16[32,32], index: 2, kind: input, shape index: {}]   ;;  %s430_s0 = inlined_call_operand.vmem [shape: f32[16,32], index: 0, kind: input, shape index: {}]   ;;  %s431_s5 = inlined_call_operand.vmem [shape: f32[2,1], index: 5, kind: input, shape index: {}]   ;;  %s432_s3 = inlined_call_operand.vmem [shape: f32[1,32], index: 3, kind: input, shape index: {}]   ;;  %s433_s4 = inlined_call_operand.vmem [shape: f32[2,32], index: 4, kind: input, shape index: {}]   ;;  %s434_s6 = inlined_call_operand.vmem [shape: f32[2,16], index: 6, kind: output, shape index: {}]  }
   0x1   :  { %323 = vmatprep.subr.bf16.mxu1 %v351_v1  ;;  %315 = vmatprep.subr.bf16.mxu0 %v351_v1  ;;  %v347_v2 = vld [vmem:[%s428_s1] sm:$0xff]   ;;  %v349_v5 = vld [vmem:[%s428_s1 + $0x8] sm:$0xff]   ;;  %v353_v20 = vmov 0.0|0.0   ;;  %v354_v21 = vmov 0   ;;  %vm340_vm7 = vmpackc.low %vm88_vm2, %vm88_vm2  ;;  %vm290_vm8 = vcmask 123904  }
   0x2   :  { %v348_v3 = vld [vmem:[%s429_s2] sm:$0xff]   ;;  %327 = vmatprep.mubr.msk.bf16.mxu1 %vm352_vm0, %v351_v1  ;;  %319 = vmatprep.mubr.msk.bf16.mxu0 %vm352_vm0, %v351_v1  ;;  %v29_v4 = vshrl.u32 %v28_v0, 7  ;;  %v350_v6 = vld [vmem:[%s429_s2 + $0x8] sm:$0xff]  }
   0x3   :  { %324 = vmatpush3.bf16.msra.mxu1 %v347_v2  ;;  %316 = vmatpush3.bf16.msra.mxu0 %v348_v3  ;;  %v24_v7 = vld [vmem:[%s430_s0] sm:$0xff]  ;;  %v25_v8 = vld [vmem:[%s430_s0 + $0x8] sm:$0xff] }
   0x4   :  { %325 = vmatprep.subr.bf16.mxu1 %v351_v1  ;;  %317 = vmatprep.subr.bf16.mxu0 %v351_v1  ;;  %vm30_vm1 = vcmp.lt.s32.totalorder %v29_v4, 7  ;;  %v33_v9 = vadd.s32 8, %v29_v4  ;;  %v38_v10 = vand.u32 7, %v29_v4  ;;  %v26_v11 = vrot.slane %v24_v7, 1  ;;  %v205_v22 = vld [vmem:[%s431_s5] sm:$0x3] }
   0x5   :  { %v27_v12 = vrot.slane %v25_v8, 1  ;;  %v66_v13 = vpack.c.bf16 %v25_v8, %v24_v7  ;;  %346 = vset.pattern.permute.xlu0 %v354_v21  ;;  %v302_v27 = vld [vmem:[%s432_s3] ss:$0 sm:$0xff] }
   0x6   :  { %v45_v14 = vand.u32 7, %v33_v9  ;;  %vm58_vm3 = vcmp.eq.s32.totalorder %v38_v10, 7  ;;  %208 = vperm.xlu0 %346, %v205_v22   ;;  %v204_v41 = vld [vmem:[%s433_s4] sm:$0x3] }
   0x7   :  { %326 = vmatpush3.bf16.msra.mxu1 %v349_v5  ;;  %318 = vmatpush3.bf16.msra.mxu0 %v350_v6  ;;  %v31_v15 = vsel %vm30_vm1, %v26_v11, %v27_v12  ;;  %v32_v16 = vsel %vm30_vm1, %v27_v12, %v26_v11 }
   0x8   :  { %vm59_vm4 = vcmp.eq.s32.totalorder %v45_v14, 7  ;;  %v64_v17 = vsel %vm58_vm3, 0.0, %v31_v15  ;;  %338 = vmatprep.subr.bf16.mxu0 %v353_v20 }
   0x9   :  { %v65_v18 = vsel %vm59_vm4, 0.0, %v32_v16 }
   0xa   :  { %328 = vmatmul.mubr.msk.bf16.vlgmr.msra.gmra.mrb[0].mxu1 %vm88_vm2, %v66_v13  ;;  %v71_v19 = vpack.c.bf16 %v65_v18, %v64_v17 }
   0xc   :  { %320 = vmatmul.mubr.msk.bf16.vlgmr.msra.gmra.mrb[0].mxu0 %vm88_vm2, %v71_v19 }
   0xd   :  { %335 = vmatprep.mubr.msk.f32.mxu0 %vm352_vm0, %v351_v1 }
  0x85   :  { %v209_v42 = vpop.permute.xlu0 %208 }
  0xdd   :  { %v182_v23 = vpop.f32.mrb[0].mxu1 }
  0xde   :  { %v329_v24 = vpop.f32.mrb[1].mxu1 }
  0xdf   :  { %v185_v25 = vpop.f32.mrb[2].mxu1  ;;  %v126_v26 = vpop.f32.mrb[0].mxu0 }
  0xe0   :  { %v330_v28 = vpop.f32.mrb[3].mxu1  ;;  %v183_v29 = vadd.f32 %v182_v23, %v126_v26  ;;  %v321_v30 = vpop.f32.mrb[1].mxu0 }
  0xe1   :  { %v129_v31 = vpop.f32.mrb[2].mxu0 }
  0xe2   :  { %v196_v32 = vadd.f32 %v302_v27, %v183_v29  ;;  %v186_v33 = vadd.f32 %v185_v25, %v129_v31  ;;  %v322_v34 = vpop.f32.mrb[3].mxu0 }
  0xe4   :  { %v200_v35 = vmul.f32 0.01, %v196_v32  ;;  %v197_v36 = vadd.f32 %v302_v27, %v186_v33  ;;  %vm198_vm5 = vcmp.ge.f32.partialorder %v196_v32, 0.0 }
  0xe6   :  { %vm199_vm6 = vcmp.ge.f32.partialorder %v197_v36, 0.0  ;;  %v201_v37 = vmul.f32 0.01, %v197_v36  ;;  %v202_v38 = vsel %vm198_vm5, %v196_v32, %v200_v35 }
  0xe8   :  { %v203_v39 = vsel %vm199_vm6, %v197_v36, %v201_v37 }
  0xe9   :  { %v339_v40 = vpack.c.bf16 %v203_v39, %v202_v38 }
  0xeb   :  { %341 = vmatpush3.bf16.xpose.msk.msra.mxu0 %vm340_vm7, %v339_v40 }
  0xf2   :  { %336 = vmatmul.mubr.msk.f32.vlgmr.msra.gmra.mrb[4].mxu0 %vm88_vm2, %v204_v41 }
 0x1c5   :  { %v286_v43 = vpop.f32.mrb[4].mxu0 }
 0x1c6   :  { %v287_v44 = vadd.f32 %v286_v43, %v209_v42  ;;  %v337_v45 = vpop.f32.mrb[5].mxu0 }
 0x1c8   :  { %291 = vst.msk [vmem:[%s434_s6] sm:$0x3] %vm290_vm8, %v287_v44 }

</bundles_post_ra>
